<compile_context>
chip_gen: v6e
topology: v6e:2x2x1
jax: 0.10.0
libtpu: 0.0.40
codegen_flags: <defaults>
</compile_context>

<pallas_src>
import functools
import math

import jax
import jax.numpy as jnp
from jax import lax
from jax.experimental import pallas as pl
from jax.experimental.pallas import tpu as pltpu


def _round_up(v, m):
    return (v + m - 1) // m * m


def _cdiv(a, b):
    return (a + b - 1) // b


def _vmem_budget():
    """Returns (tile-picker budget bytes, vmem_limit_bytes), chip-aware."""
    mib = 1024 * 1024
    try:
        cap = int(pltpu.get_tpu_info().vmem_capacity_bytes)
    except Exception:
        cap = 64 * mib  # conservative fallback (v7x per-TC size)
    budget = min(cap // 2, 64 * mib)        # v5e/v6e: 64 MiB, v7x: 32 MiB
    limit = min((3 * cap) // 4, 96 * mib)   # v5e/v6e: 96 MiB, v7x: 48 MiB
    return budget, limit


def _pick_row_tile(n, fea_dim, mem_dim, m_pad, x_itemsize, mm_itemsize, budget_bytes):
    """Largest row tile whose I/O blocks + resident weights + f32 temps fit the budget."""
    tile = min(2048, _round_up(max(n, 8), 8))
    while True:
        io_bytes = 2 * tile * (2 * fea_dim + mem_dim) * x_itemsize   # x/out/att, double-buffered
        w_bytes = 2 * m_pad * fea_dim * mm_itemsize                  # W + W^T, single-buffered
        tmp_bytes = tile * (4 * m_pad + 2 * fea_dim) * 4             # in-kernel f32 temporaries
        if io_bytes + w_bytes + tmp_bytes <= budget_bytes or tile <= 8:
            return tile
        tile = max(8, _round_up(tile // 2, 8))


def _mem_kernel(x_ref, wt_ref, w_ref, out_ref, att_ref, *,
                shrink_thres, mem_dim, mm_dtype):
    mm_dtype = jnp.dtype(mm_dtype)
    x = x_ref[...].astype(mm_dtype)    # (tile_n, F)
    wt = wt_ref[...]                   # (F, M_pad)  resident, already mm_dtype
    w = w_ref[...]                     # (M_pad, F)  resident, already mm_dtype

    # att_weight = x @ W^T as a plain [N,K]x[K,M] MXU matmul (W^T pre-materialized),
    # f32 accumulation.
    logits = jnp.dot(x, wt, preferred_element_type=jnp.float32)   # (tile_n, M_pad) f32

    # Mask padded memory slots so they contribute nothing to the softmax.
    m_pad = logits.shape[1]
    if m_pad > mem_dim:
        col = lax.broadcasted_iota(jnp.int32, logits.shape, 1)
        logits = jnp.where(col < mem_dim, logits, jnp.float32(-1e30))

    # Row-wise softmax over memory slots: N cheap exact reciprocals + broadcast mul.
    logits = logits - jnp.max(logits, axis=1, keepdims=True)
    e = jnp.exp(logits)
    att = e * pl.reciprocal(jnp.sum(e, axis=1, keepdims=True), approx=False)

    if shrink_thres > 0:
        lambd = jnp.float32(shrink_thres)
        eps = jnp.float32(1e-12)
        shifted = att - lambd
        # hard_shrink_relu(att) = relu(att-l)*att/(|att-l|+eps)
        #                       = where(att > l, att*(att-l)/((att-l)+eps), 0)
        # (single fused pass; full-tile reciprocal goes to the EUP slot).
        att = jnp.where(
            att > lambd,
            att * shifted * pl.reciprocal(shifted + eps, approx=True),
            jnp.float32(0.0))
        # att >= 0 here, so the L1 norm is just the row sum.
        l1 = jnp.maximum(jnp.sum(att, axis=1, keepdims=True), jnp.float32(1e-12))
        att = att * pl.reciprocal(l1, approx=False)

    # output = att @ W, plain [N,K]x[K,M] MXU matmul, f32 accumulation.
    out = jnp.dot(att.astype(mm_dtype), w, preferred_element_type=jnp.float32)

    out_ref[...] = out.astype(out_ref.dtype)
    att_ref[...] = att[:, :mem_dim].astype(att_ref.dtype)


def mem_module_forward(x, weight, shrink_thres=0.0025, row_tile=None, matmul_dtype=None):
    """x: (N, fea_dim), weight: (mem_dim, fea_dim). Returns dict(output, att)."""
    n, fea_dim = x.shape
    mem_dim, fea_dim_w = weight.shape
    assert fea_dim == fea_dim_w

    # Matmul operand dtype: bf16 when the input is f32 (f32 accumulation keeps the
    # epilogue numerics); otherwise the input dtype. Override via matmul_dtype.
    if matmul_dtype is None:
        matmul_dtype = jnp.bfloat16 if x.dtype == jnp.float32 else x.dtype
    matmul_dtype = jnp.dtype(matmul_dtype)

    # Only the (tiny, one-time) memory axis of W is padded, keeping logits/att
    # lane-dense inside the kernel. x / out / att stay unpadded in HBM.
    m_pad = _round_up(mem_dim, 128)
    w_p = jnp.pad(weight.astype(matmul_dtype), ((0, m_pad - mem_dim), (0, 0)))  # (M_pad, F)
    wt_p = jnp.transpose(w_p)                                                    # (F, M_pad)

    budget, vmem_limit = _vmem_budget()
    x_itemsize = jnp.dtype(x.dtype).itemsize
    if row_tile is None:
        tile_n = _pick_row_tile(n, fea_dim, mem_dim, m_pad,
                                x_itemsize, matmul_dtype.itemsize, budget)
    else:
        tile_n = max(8, _round_up(row_tile, 8))
    # Never allocate a block much larger than the data ...
    tile_n = min(tile_n, _round_up(max(n, 1), 8))
    # ... and guarantee >= 2 grid steps when possible so the "parallel" row axis
    # can shard across both v7x TensorCores.
    if n > 8:
        tile_n = min(tile_n, _round_up(_cdiv(n, 2), 8))

    grid = (_cdiv(n, tile_n),)

    kernel = functools.partial(
        _mem_kernel, shrink_thres=float(shrink_thres),
        mem_dim=mem_dim, mm_dtype=matmul_dtype)

    out, att = pl.pallas_call(
        kernel,
        out_shape=(
            jax.ShapeDtypeStruct((n, fea_dim), x.dtype),
            jax.ShapeDtypeStruct((n, mem_dim), x.dtype),
        ),
        grid=grid,
        in_specs=[
            pl.BlockSpec((tile_n, fea_dim), lambda i: (i, 0)),          # row tile of x
            pl.BlockSpec((fea_dim, m_pad), lambda i: (0, 0),            # W^T resident,
                         pipeline_mode=pl.Buffered(1)),                 # single-buffered
            pl.BlockSpec((m_pad, fea_dim), lambda i: (0, 0),            # W resident,
                         pipeline_mode=pl.Buffered(1)),                 # single-buffered
        ],
        out_specs=(
            pl.BlockSpec((tile_n, fea_dim), lambda i: (i, 0)),
            pl.BlockSpec((tile_n, mem_dim), lambda i: (i, 0)),
        ),
        compiler_params=pltpu.CompilerParams(
            dimension_semantics=("parallel",),   # row tiles shard across TCs on v7x
            vmem_limit_bytes=vmem_limit,
        ),
    )(x, wt_p, w_p)

    return {"output": out, "att": att}


def _reference(x, weight, shrink_thres=0.0025):
    """Pure-JAX f32 reference mirroring the PyTorch forward."""
    logits = x @ weight.T
    att = jax.nn.softmax(logits, axis=1)
    if shrink_thres > 0:
        shifted = att - shrink_thres
        att = jnp.maximum(shifted, 0.0) * att / (jnp.abs(shifted) + 1e-12)
        att = att / jnp.maximum(jnp.sum(jnp.abs(att), axis=1, keepdims=True), 1e-12)
    out = att @ weight
    return out, att


if __name__ == "__main__":
    FEA_DIM = 32   # feature dim
    MEM_DIM = 64   # number of memory slots
    SHRINK_THRES = 0.0025

    key = jax.random.PRNGKey(0)
    kx, kw, kx2 = jax.random.split(key, 3)

    # Deterministic init matching reset_parameters(): uniform(-stdv, stdv), stdv = 1/sqrt(fea_dim)
    stdv = 1.0 / math.sqrt(FEA_DIM)
    weight = jax.random.uniform(kw, (MEM_DIM, FEA_DIM), dtype=jnp.float32,
                                minval=-stdv, maxval=stdv)

    # Case 1: small batch, single grid step, default (bf16 matmul operands, f32 accum).
    N1 = 8
    x1 = jax.random.normal(kx, (N1, FEA_DIM), dtype=jnp.float32)
    res1 = mem_module_forward(x1, weight, SHRINK_THRES)
    out1 = jax.block_until_ready(res1["output"])
    att1 = jax.block_until_ready(res1["att"])
    ref_out1, ref_att1 = _reference(x1, weight, SHRINK_THRES)
    assert out1.shape == (N1, FEA_DIM) and att1.shape == (N1, MEM_DIM)
    # With bf16 matmul operands, an att entry lying within ~1e-5 of the hard-shrink
    # threshold can flip across it (diff up to shrink_thres) -> looser att atol.
    assert jnp.allclose(out1, ref_out1, atol=2e-3, rtol=1e-2)
    assert jnp.allclose(att1, ref_att1, atol=4e-3, rtol=1e-2)

    # Case 2: ragged row-tiled grid (40 rows, tile 16 -> 3 steps, partial last block).
    N2 = 40
    x2 = jax.random.normal(kx2, (N2, FEA_DIM), dtype=jnp.float32)
    res2 = mem_module_forward(x2, weight, SHRINK_THRES, row_tile=16)
    out2 = jax.block_until_ready(res2["output"])
    att2 = jax.block_until_ready(res2["att"])
    ref_out2, ref_att2 = _reference(x2, weight, SHRINK_THRES)
    assert out2.shape == (N2, FEA_DIM) and att2.shape == (N2, MEM_DIM)
    assert jnp.allclose(out2, ref_out2, atol=2e-3, rtol=1e-2)
    assert jnp.allclose(att2, ref_att2, atol=4e-3, rtol=1e-2)

    # Case 3: exact-precision path (f32 matmul operands), auto-picked tile (2 ragged steps).
    res3 = mem_module_forward(x2, weight, SHRINK_THRES, matmul_dtype=jnp.float32)
    out3 = jax.block_until_ready(res3["output"])
    att3 = jax.block_until_ready(res3["att"])
    assert jnp.allclose(out3, ref_out2, atol=1e-4, rtol=1e-3)
    assert jnp.allclose(att3, ref_att2, atol=1e-4, rtol=1e-3)

    print("KERNEL_OK")
</pallas_src>

<mosaic_0001>
module attributes {stable_mosaic.version = 11 : i64} {
  func.func @_mem_kernel(%arg0: i32, %arg1: memref<8x32xf32, #tpu.memory_space<vmem>>, %arg2: memref<32x128xbf16, #tpu.memory_space<vmem>>, %arg3: memref<128x32xbf16, #tpu.memory_space<vmem>>, %arg4: memref<8x32xf32, #tpu.memory_space<vmem>>, %arg5: memref<8x64xf32, #tpu.memory_space<vmem>>) attributes {dimension_semantics = [#tpu.dimension_semantics<parallel>], iteration_bounds = array<i64: 1>, scalar_prefetch = 0 : i64, scratch_operands = 0 : i64, tpu.core_type = #tpu.core_type<tc>, window_params = [{transform_indices = @transform_0, window_bounds = array<i64: 8, 32>}, {pipeline_mode = #tpu.pipeline_mode<synchronous>, transform_indices = @transform_1, window_bounds = array<i64: 32, 128>}, {pipeline_mode = #tpu.pipeline_mode<synchronous>, transform_indices = @transform_2, window_bounds = array<i64: 128, 32>}, {transform_indices = @transform_3, window_bounds = array<i64: 8, 32>}, {transform_indices = @transform_4, window_bounds = array<i64: 8, 64>}]} {
    %c0 = arith.constant 0 : index
    %c0_0 = arith.constant 0 : index
    %0 = vector.load %arg1[%c0, %c0_0] : memref<8x32xf32, #tpu.memory_space<vmem>>, vector<8x32xf32>
    %1 = arith.truncf %0 : vector<8x32xf32> to vector<8x32xbf16>
    %c0_1 = arith.constant 0 : index
    %c0_2 = arith.constant 0 : index
    %2 = vector.load %arg2[%c0_1, %c0_2] : memref<32x128xbf16, #tpu.memory_space<vmem>>, vector<32x128xbf16>
    %c0_3 = arith.constant 0 : index
    %c0_4 = arith.constant 0 : index
    %3 = vector.load %arg3[%c0_3, %c0_4] : memref<128x32xbf16, #tpu.memory_space<vmem>>, vector<128x32xbf16>
    %cst = arith.constant dense<0.000000e+00> : vector<8x128xf32>
    %4 = tpu.matmul %1, %2, %cst {dimension_numbers = #tpu.dot_dimension_numbers<[1], [0], [0], [1], [0, 0, 1, 1], [], []>} : vector<8x32xbf16>, vector<32x128xbf16>, vector<8x128xf32> -> vector<8x128xf32>
    %5 = tpu.iota {dimensions = array<i32: 1>} : vector<8x128xi32>
    %c64_i32 = arith.constant 64 : i32
    %6 = vector.broadcast %c64_i32 : i32 to vector<8x128xi32>
    %7 = arith.cmpi slt, %5, %6 : vector<8x128xi32>
    %cst_5 = arith.constant -1.000000e+30 : f32
    %8 = vector.broadcast %cst_5 : f32 to vector<8x128xf32>
    %9 = arith.select %7, %4, %8 : vector<8x128xi1>, vector<8x128xf32>
    %cst_6 = arith.constant dense<0xFF800000> : vector<8xf32>
    %10 = vector.multi_reduction <maximumf>, %9, %cst_6 [1] : vector<8x128xf32> to vector<8xf32>
    %11 = vector.shape_cast %10 : vector<8xf32> to vector<8x1xf32>
    %12 = vector.broadcast %11 : vector<8x1xf32> to vector<8x128xf32>
    %13 = arith.subf %9, %12 : vector<8x128xf32>
    %14 = math.exp %13 : vector<8x128xf32>
    %cst_7 = arith.constant dense<0.000000e+00> : vector<8xf32>
    %15 = vector.multi_reduction <add>, %14, %cst_7 [1] : vector<8x128xf32> to vector<8xf32>
    %16 = vector.shape_cast %15 : vector<8xf32> to vector<8x1xf32>
    %17 = tpu.reciprocal %16 : vector<8x1xf32> -> vector<8x1xf32>
    %18 = vector.broadcast %17 : vector<8x1xf32> to vector<8x128xf32>
    %19 = arith.mulf %14, %18 : vector<8x128xf32>
    %cst_8 = arith.constant 2.500000e-03 : f32
    %20 = vector.broadcast %cst_8 : f32 to vector<8x128xf32>
    %21 = arith.subf %19, %20 : vector<8x128xf32>
    %cst_9 = arith.constant 2.500000e-03 : f32
    %22 = vector.broadcast %cst_9 : f32 to vector<8x128xf32>
    %23 = arith.cmpf ogt, %19, %22 : vector<8x128xf32>
    %24 = arith.mulf %19, %21 : vector<8x128xf32>
    %cst_10 = arith.constant 9.99999996E-13 : f32
    %25 = vector.broadcast %cst_10 : f32 to vector<8x128xf32>
    %26 = arith.addf %21, %25 : vector<8x128xf32>
    %27 = tpu.reciprocal %26 {approx = true} : vector<8x128xf32> -> vector<8x128xf32>
    %28 = arith.mulf %24, %27 : vector<8x128xf32>
    %cst_11 = arith.constant 0.000000e+00 : f32
    %29 = vector.broadcast %cst_11 : f32 to vector<8x128xf32>
    %30 = arith.select %23, %28, %29 : vector<8x128xi1>, vector<8x128xf32>
    %cst_12 = arith.constant dense<0.000000e+00> : vector<8xf32>
    %31 = vector.multi_reduction <add>, %30, %cst_12 [1] : vector<8x128xf32> to vector<8xf32>
    %32 = vector.shape_cast %31 : vector<8xf32> to vector<8x1xf32>
    %cst_13 = arith.constant 9.99999996E-13 : f32
    %33 = vector.broadcast %cst_13 : f32 to vector<8x1xf32>
    %34 = arith.maximumf %32, %33 : vector<8x1xf32>
    %35 = tpu.reciprocal %34 : vector<8x1xf32> -> vector<8x1xf32>
    %36 = vector.broadcast %35 : vector<8x1xf32> to vector<8x128xf32>
    %37 = arith.mulf %30, %36 : vector<8x128xf32>
    %38 = arith.truncf %37 : vector<8x128xf32> to vector<8x128xbf16>
    %cst_14 = arith.constant dense<0.000000e+00> : vector<8x32xf32>
    %39 = tpu.matmul %38, %3, %cst_14 {dimension_numbers = #tpu.dot_dimension_numbers<[1], [0], [0], [1], [0, 0, 1, 1], [], []>} : vector<8x128xbf16>, vector<128x32xbf16>, vector<8x32xf32> -> vector<8x32xf32>
    %c0_15 = arith.constant 0 : index
    %c0_16 = arith.constant 0 : index
    %40 = vector.load %arg4[%c0_15, %c0_16] : memref<8x32xf32, #tpu.memory_space<vmem>>, vector<8x32xf32>
    tpu.vector_store %arg4[%c0_15, %c0_16], %39 {strides = array<i32>} : memref<8x32xf32, #tpu.memory_space<vmem>>, vector<8x32xf32>,
    %41 = vector.extract_strided_slice %37 {offsets = [0, 0], sizes = [8, 64], strides = [1, 1]} : vector<8x128xf32> to vector<8x64xf32>
    %c0_17 = arith.constant 0 : index
    %c0_18 = arith.constant 0 : index
    %42 = vector.load %arg5[%c0_17, %c0_18] : memref<8x64xf32, #tpu.memory_space<vmem>>, vector<8x64xf32>
    tpu.vector_store %arg5[%c0_17, %c0_18], %41 {strides = array<i32>} : memref<8x64xf32, #tpu.memory_space<vmem>>, vector<8x64xf32>,
    return
  }
  func.func @transform_0(%arg0: i32) -> (i32, i32) {
    %c0_i32 = arith.constant 0 : i32
    %c0_i32_0 = arith.constant 0 : i32
    return %arg0, %c0_i32 : i32, i32
  }
  func.func @transform_1(%arg0: i32) -> (i32, i32) {
    %c0_i32 = arith.constant 0 : i32
    %c0_i32_0 = arith.constant 0 : i32
    %c0_i32_1 = arith.constant 0 : i32
    return %c0_i32, %c0_i32_0 : i32, i32
  }
  func.func @transform_2(%arg0: i32) -> (i32, i32) {
    %c0_i32 = arith.constant 0 : i32
    %c0_i32_0 = arith.constant 0 : i32
    %c0_i32_1 = arith.constant 0 : i32
    return %c0_i32, %c0_i32_0 : i32, i32
  }
  func.func @transform_3(%arg0: i32) -> (i32, i32) {
    %c0_i32 = arith.constant 0 : i32
    %c0_i32_0 = arith.constant 0 : i32
    return %arg0, %c0_i32 : i32, i32
  }
  func.func @transform_4(%arg0: i32) -> (i32, i32) {
    %c0_i32 = arith.constant 0 : i32
    %c0_i32_0 = arith.constant 0 : i32
    return %arg0, %c0_i32 : i32, i32
  }
}

</mosaic_0001>

<bundles_post_ra>
// kernel: tpu_custom_call.1
= control target key start
LH: loop header
LB: loop body
LE: loop exit
PB: predicated region body
PF: predicated region fallthrough
CT: control target
= control target key end

     0   :  { %10 = vsyncpa [#allocation3], 0  ;;  %v360_v1 = vmov 0.0   ;;  %vm361_vm0 = vmmov 0   ;;  %vm53_vm1 = vcmask 261120   ;;  %s442_s0 = inlined_call_operand.vmem [shape: f32[8,32], index: 0, kind: input, shape index: {}]   ;;  %s443_s1 = inlined_call_operand.vmem [shape: bf16[32,128], index: 1, kind: input, shape index: {}]   ;;  %s444_s2 = inlined_call_operand.vmem [shape: bf16[128,32], index: 2, kind: input, shape index: {}]   ;;  %s445_s3 = inlined_call_operand.hbm [shape: f32[8,32], index: 3, kind: output, shape index: {0}]   ;;  %s446_s4 = inlined_call_operand.hbm [shape: f32[8,64], index: 4, kind: output, shape index: {1}]  }
   0x1   :  { %v298_v0 = vld [vmem:[%s443_s1 + $0x8] sm:$0xff]   ;;  %266 = vmatprep.subr.bf16.mxu0 %v360_v1  ;;  %v299_v2 = vld [vmem:[%s443_s1] sm:$0xff]   ;;  %274 = vmatprep.subr.bf16.mxu1 %v360_v1 }
   0x2   :  { %267 = vmatpush3.bf16.msra.mxu0 %v298_v0  ;;  %270 = vmatprep.mubr.msk.bf16.mxu0 %vm361_vm0, %v360_v1  ;;  %v19_v3 = vld [vmem:[%s442_s0] sm:$0xff] }
   0x3   :  { %268 = vmatprep.subr.bf16.mxu0 %v360_v1  ;;  %290 = vmatprep.mubr.msk.bf16.mxu1 %vm361_vm0, %v360_v1  ;;  %v20_v4 = vpack.c.bf16 %v19_v3, %v19_v3 }
   0x6   :  { %269 = vmatpush3.bf16.msra.mxu0 %v299_v2 }
   0x7   :  { %11 = vsyncpa [#allocation5], 0  ;;  %v97_v5 = vlaneseq  ;;  %v300_v16 = vld [vmem:[%s444_s2 + $0x38] sm:$0xff]   ;;  %v301_v17 = vld [vmem:[%s444_s2 + $0x30] sm:$0xff]   ;;  %vm212_vm4 = vcmask 523264   ;;  %s362_s9 = smov [#allocation4]  }
   0x8   :  { %275 = vmatpush3.bf16.msra.mxu1 %v300_v16  ;;  %v302_v18 = vld [vmem:[%s444_s2 + $0x28] sm:$0xff]   ;;  %v303_v28 = vld [vmem:[%s444_s2 + $0x20] sm:$0xff]   ;;  %v304_v29 = vld [vmem:[%s444_s2 + $0x18] sm:$0xff]   ;;  %s230_s10 = sshll.u32 %s362_s9, 4  ;;  %s231_s10 = int_to_ptr.vmem [resolvable:$true] %s230_s10 }
   0x9   :  { %271 = vmatmul.mubr.msk.bf16.vlgmr.msra.gmra.mxu0 %vm53_vm1, %v20_v4  ;;  %v98_v6 = vand.u32 127, %v97_v5  ;;  %276 = vmatprep.subr.bf16.mxu1 %v360_v1  ;;  %v305_v30 = vld [vmem:[%s444_s2 + $0x10] sm:$0xff]   ;;  %v306_v31 = vld [vmem:[%s444_s2 + $0x8] sm:$0xff]   ;;  %v307_v32 = vld [vmem:[%s444_s2] sm:$0xff]   ;;  %s316_s11 = scalar_lea.vmem %s231_s10, 128  ;;  %p321_p1 = scmp.lt.s32.totalorder %s231_s10, %s231_s10 }
   0xa   :  { %p317_p0 = scmp.ne.s32.totalorder %s231_s10, %s316_s11  ;;  %p322_p2 = scmp.lt.s32.totalorder %s316_s11, %s316_s11 }
   0xb   :  { %vm99_vm2 = vcmp.lt.s32.totalorder %v98_v6, 64 }
   0xc   :  { %277 = vmatpush3.bf16.msra.mxu1 %v301_v17  ;;  %p323_p3 = por %p322_p2, %p321_p1 }
   0xd   :  { %278 = vmatprep.subr.bf16.mxu1 %v360_v1 }
   0xe   :  { %p324_p4 = pnand %p323_p3, %p317_p0 }
  0x10   :  { %279 = vmatpush3.bf16.msra.mxu1 %v302_v18 }
  0x11   :  { %280 = vmatprep.subr.bf16.mxu1 %v360_v1 }
  0x14   :  { %281 = vmatpush3.bf16.msra.mxu1 %v303_v28 }
  0x15   :  { %282 = vmatprep.subr.bf16.mxu1 %v360_v1 }
  0x18   :  { %283 = vmatpush3.bf16.msra.mxu1 %v304_v29 }
  0x19   :  { %284 = vmatprep.subr.bf16.mxu1 %v360_v1 }
  0x1c   :  { %285 = vmatpush3.bf16.msra.mxu1 %v305_v30 }
  0x1d   :  { %286 = vmatprep.subr.bf16.mxu1 %v360_v1 }
  0x20   :  { %287 = vmatpush3.bf16.msra.mxu1 %v306_v31 }
  0x21   :  { %288 = vmatprep.subr.bf16.mxu1 %v360_v1 }
  0x24   :  { %289 = vmatpush3.bf16.msra.mxu1 %v307_v32 }
  0xc9   :  { %v91_v7 = vpop.f32.mrf.mxu0 }
  0xca   :  { %v100_v8 = vsel %vm99_vm2, %v91_v7, -1e+30 }
  0xcb   :  { %101 = vmax.xlane.f32.xlu0 %v100_v8  ;;  %v272_v9 = vpop.f32.mrf.mxu0 }
  0xcd   :  { %v94_v10 = vpop.f32.mrf.mxu0 }
  0xcf   :  { %v273_v11 = vpop.f32.mrf.mxu0 }
 0x154   :  { %v102_v12 = vpop.xlane.xlu0 %101 }
 0x155   :  { %v103_v13 = vsub.f32 %v100_v8, %v102_v12 }
 0x157   :  { %v104_v14 = vmul.f32 1.442695, %v103_v13 }
 0x159   :  { %308 = vpow2.f32 %v104_v14 }
 0x166   :  { %v309_v15 = vpop.eup %308 }
 0x167   :  { %106 = vadd.xlane.f32.xlu0 %v309_v15 }
 0x1f0   :  { %v107_v19 = vpop.xlane.xlu0 %106 }
 0x1f1   :  { %310 = vrcp.f32 %v107_v19 }
 0x1fe   :  { %v311_v20 = vpop.eup %310 }
 0x1ff   :  { %v109_v21 = vmul.f32 %v311_v20, %v309_v15 }
 0x201   :  { %v245_v22 = vadd.f32 -0.0025, %v109_v21  ;;  %vm111_vm3 = vcmp.gt.f32.partialorder %v109_v21, 0.0025 }
 0x203   :  { %v113_v23 = vadd.f32 1e-12, %v245_v22  ;;  %v112_v24 = vmul.f32 %v245_v22, %v109_v21 }
 0x205   :  { %312 = vrcp.f32 %v113_v23 }
 0x212   :  { %v313_v25 = vpop.eup %312 }
 0x213   :  { %v115_v26 = vmul.f32 %v313_v25, %v112_v24 }
 0x215   :  { %v116_v27 = vsel %vm111_vm3, %v115_v26, 0.0 }
 0x216   :  { %117 = vadd.xlane.f32.xlu1 %v116_v27 }
 0x29f   :  { %v118_v33 = vpop.xlane.xlu1 %117 }
 0x2a0   :  { %v119_v34 = vmax.f32 %v118_v33, 1e-12 }
 0x2a2   :  { %314 = vrcp.f32 %v119_v34 }
 0x2af   :  { %v315_v35 = vpop.eup %314 }
 0x2b0   :  { %v121_v36 = vmul.f32 %v315_v35, %v116_v27 }
 0x2b2   :  { %v122_v37 = vpack.c.bf16 %v121_v36, %v121_v36  ;;  %213 = vst.msk [vmem:[#allocation4] sm:$0xff] %vm212_vm4, %v121_v36 }
 0x2b4   :  { %291 = vmatmul.mubr.bf16.vlgmr.msra.gmra.mxu1 %v122_v37 }
 0x2b5   :  { %327 = shalt.err (!%p324_p4)
}
 0x2b6   :  { %233 = dma.vmem_to_hbm [thread:$0]  %s231_s10, 128, %s446_s4, [#allocation5]  }
 0x2b7   :  { %s363_s13 = smov [#allocation2]  }
 0x2b8   :  { %s220_s14 = sshll.u32 %s363_s13, 4  ;;  %s221_s14 = int_to_ptr.vmem [resolvable:$true] %s220_s14 }
 0x2b9   :  { %s336_s15 = scalar_lea.vmem %s221_s14, 128  ;;  %p341_p6 = scmp.lt.s32.totalorder %s221_s14, %s221_s14 }
 0x2ba   :  { %p337_p5 = scmp.ne.s32.totalorder %s221_s14, %s336_s15  ;;  %p342_p7 = scmp.lt.s32.totalorder %s336_s15, %s336_s15 }
 0x2bc   :  { %p343_p8 = por %p342_p7, %p341_p6 }
 0x2be   :  { %p344_p9 = pnand %p343_p8, %p337_p5 }
 0x374   :  { %v205_v38 = vpop.f32.mrf.mxu1 }
 0x375   :  { %211 = vst.msk [vmem:[#allocation2] sm:$0xff] %vm53_vm1, %v205_v38 }
 0x376   :  { %v292_v39 = vpop.f32.mrf.mxu1 }
 0x377   :  { %347 = shalt.err (!%p344_p9)
}
 0x378   :  { %223 = dma.vmem_to_hbm [thread:$0]  %s221_s14, 128, %s445_s3, [#allocation3]   ;;  %v208_v40 = vpop.f32.mrf.mxu1 }
 0x37a   :  { %v293_v41 = vpop.f32.mrf.mxu1 }
 0x37b   :  { %356 = dma.done.wait [#allocation3], 128  }
 0x37c   :  { %357 = vsyncadd [#allocation3], 4294967168 }
 0x37d   :  { %358 = dma.done.wait [#allocation5], 128  }
 0x37e   :  { %359 = vsyncadd [#allocation5], 4294967168 }
 0x37f   :  { %240 = vsyncpa [#allocation3], 1 }
 0x380   :  { %241 = vsyncpa [#allocation5], 1 }

</bundles_post_ra>
